<compile_context>
chip_gen: v7x
topology: tpu7x:2x2x1
jax: 0.10.0
libtpu: 0.0.40
codegen_flags: <defaults>
</compile_context>

<pallas_src>
import functools

import jax
import jax.numpy as jnp
from jax.experimental import pallas as pl
from jax.experimental.pallas import tpu as pltpu


# dot_general dimension numbers (2-D and head-batched 3-D).
_NT_2D = (((1,), (1,)), ((), ()))          # contract last dim of both operands
_TN_2D = (((0,), (0,)), ((), ()))          # contract first dim of both operands
_TN_HEADS = (((1,), (1,)), ((0,), (0,)))   # batch over heads, contract hd dims
_NN_HEADS = (((2,), (1,)), ((0,), (0,)))   # batch over heads, contract N dims


def _kv_project_kernel(x_ref, wkvT_ref, kvT_ref):
    """kvT[b, :, rows] = W_kv^T @ x[b, rows, :]^T   (contraction over C)."""
    kvT = jax.lax.dot_general(wkvT_ref[...], x_ref[0], _NT_2D,
                              preferred_element_type=jnp.float32)    # (2C, TN)
    kvT_ref[0] = kvT.astype(kvT_ref.dtype)


def _attention_kernel(x_ref, kvT_ref, wqT_ref, wproj_ref, bproj_ref, o_ref,
                      *, num_heads, head_dim):
    H, hd = num_heads, head_dim
    C = H * hd
    TQ = x_ref.shape[1]
    N = kvT_ref.shape[2]
    bf = x_ref.dtype

    x_t = x_ref[0]                                                   # (TQ, C) bf16

    # Q projection for this tile: qT = W_q^T @ x^T  (scale folded into W_q on
    # the host).  Contraction over C -> MXU-efficient; transposed result is
    # head-sliceable along sublanes with zero relayout.
    qT = jax.lax.dot_general(wqT_ref[...], x_t, _NT_2D,
                             preferred_element_type=jnp.float32)     # (C, TQ)
    qh = qT.astype(bf).reshape(H, hd, TQ)                            # free reshape

    kvT = kvT_ref[0]                                                 # (2C, N) bf16
    kh = kvT[:C, :].reshape(H, hd, N)                                # (H, hd, N)
    vh = kvT[C:, :].reshape(H, hd, N)                                # (H, hd, N)

    # Transposed scores for all heads: sT[h, k, q] = sum_d k[h,d,k] * q[h,d,q].
    sT = jax.lax.dot_general(kh, qh, _TN_HEADS,
                             preferred_element_type=jnp.float32)     # (H, N, TQ)

    # Softmax over keys (axis 1); statistics stay f32.
    sT = sT - jnp.max(sT, axis=1, keepdims=True)
    p = jnp.exp(sT)                                                  # (H, N, TQ)
    denom = jnp.sum(p, axis=1, keepdims=True)                        # (H, 1, TQ)
    # attn_drop has p=0.0 -> identity.

    # Unnormalized context^T: contraction over N (deep, MXU-efficient).
    ctxT = jax.lax.dot_general(vh, p.astype(bf), _NN_HEADS,
                               preferred_element_type=jnp.float32)   # (H, hd, TQ)

    # Deferred softmax normalization on (H, hd, TQ) instead of (H, N, TQ).
    ctxT = ctxT * pl.reciprocal(denom, approx=True)

    # Merge heads (free leading-dim reshape) and project with full-C
    # contraction; lane-dense (TQ, C) output.  proj_drop has p=0.0 -> identity.
    ctxT = ctxT.reshape(C, TQ).astype(bf)
    out = jax.lax.dot_general(ctxT, wproj_ref[...], _TN_2D,
                              preferred_element_type=jnp.float32)    # (TQ, C)
    out = out + bproj_ref[...]
    o_ref[0] = out.astype(o_ref.dtype)


def attention(x, w_qkv, w_proj, b_proj, *, num_heads, q_tile=256, n_tile=256,
              compute_dtype=jnp.bfloat16):
    """Pallas forward of the ViT Attention module.

    x: (B, N, C); w_qkv: (C, 3C) and w_proj: (C, C) in (in, out) layout
    (i.e. already PyTorch weight.T); b_proj: (C,).
    """
    B, N, C = x.shape
    assert C % num_heads == 0
    head_dim = C // num_heads
    assert head_dim % 8 == 0, "head_dim must be a multiple of 8 (sublane tile)"

    out_dtype = x.dtype
    scale = head_dim ** (-0.5)

    # ---- one-off host-side parameter prep -------------------------------
    # Fold softmax scale into W_q; pre-transpose weights so the kernels emit
    # channel-major (transposed) activations straight off the MXU; bf16 ops.
    w_qT = (w_qkv[:, :C] * scale).T.astype(compute_dtype)            # (C, C)
    w_kvT = w_qkv[:, C:].T.astype(compute_dtype)                     # (2C, C)
    w_proj_c = w_proj.astype(compute_dtype)                          # (C, C)
    b_proj_2d = b_proj.reshape(1, C).astype(jnp.float32)             # (1, C)
    x_c = x.astype(compute_dtype)

    # Tile sizes.  TODO(synk): pad N instead of falling back to a single tile
    # when it is not divisible by the requested tile size.
    tq = q_tile if N % q_tile == 0 else N
    tn = n_tile if N % n_tile == 0 else N
    if tq < N:
        assert tq % 8 == 0
    if tn < N:
        assert tn % 8 == 0

    itemsize_c = jnp.dtype(compute_dtype).itemsize
    single_buf = pl.Buffered(1)     # grid-invariant operands: no double buffer

    # ---- call 1: K/V projection, transposed layout ----------------------
    kv_cost = pl.CostEstimate(
        flops=int(4 * B * N * C * C),
        transcendentals=0,
        bytes_accessed=int((B * N * C + 2 * C * C + B * 2 * C * N) * itemsize_c),
    )
    kvT = pl.pallas_call(
        _kv_project_kernel,
        out_shape=jax.ShapeDtypeStruct((B, 2 * C, N), compute_dtype),
        grid_spec=pltpu.PrefetchScalarGridSpec(
            num_scalar_prefetch=0,
            grid=(B, N // tn),
            in_specs=[
                pl.BlockSpec((1, tn, C), lambda b, ni: (b, ni, 0)),      # x rows
                pl.BlockSpec((2 * C, C), lambda b, ni: (0, 0),
                             pipeline_mode=single_buf),                  # W_kv^T
            ],
            out_specs=pl.BlockSpec((1, 2 * C, tn), lambda b, ni: (b, 0, ni)),
        ),
        compiler_params=pltpu.CompilerParams(
            dimension_semantics=("parallel", "parallel"),
            vmem_limit_bytes=48 * 1024 * 1024,
        ),
        cost_estimate=kv_cost,
    )(x_c, w_kvT)

    # ---- call 2: attention + output projection --------------------------
    kernel = functools.partial(_attention_kernel,
                               num_heads=num_heads, head_dim=head_dim)
    attn_cost = pl.CostEstimate(
        flops=int(4 * B * N * C * (C + N)),
        transcendentals=int(B * num_heads * N * N),
        bytes_accessed=int((B * N * C + B * 2 * C * N + 2 * C * C) * itemsize_c
                           + C * 4
                           + B * N * C * jnp.dtype(out_dtype).itemsize),
    )
    out = pl.pallas_call(
        kernel,
        out_shape=jax.ShapeDtypeStruct((B, N, C), out_dtype),
        grid_spec=pltpu.PrefetchScalarGridSpec(
            num_scalar_prefetch=0,
            grid=(B, N // tq),
            in_specs=[
                pl.BlockSpec((1, tq, C), lambda b, qi: (b, qi, 0)),      # x query tile
                pl.BlockSpec((1, 2 * C, N), lambda b, qi: (b, 0, 0)),    # kvT full seq
                pl.BlockSpec((C, C), lambda b, qi: (0, 0),
                             pipeline_mode=single_buf),                  # W_q^T
                pl.BlockSpec((C, C), lambda b, qi: (0, 0),
                             pipeline_mode=single_buf),                  # W_proj
                pl.BlockSpec((1, C), lambda b, qi: (0, 0),
                             pipeline_mode=single_buf),                  # b_proj
            ],
            out_specs=pl.BlockSpec((1, tq, C), lambda b, qi: (b, qi, 0)),
        ),
        compiler_params=pltpu.CompilerParams(
            # K/V projection hoisted -> no cross-query-tile state, so both grid
            # axes shard across TensorCores (matters for small B on v7x).
            dimension_semantics=("parallel", "parallel"),
            vmem_limit_bytes=48 * 1024 * 1024,
        ),
        cost_estimate=attn_cost,
    )(x_c, kvT, w_qT, w_proj_c, b_proj_2d)
    return out


def attention_ref(x, w_qkv, w_proj, b_proj, *, num_heads):
    """Pure-JAX f32 reference mirroring the PyTorch forward."""
    B, N, C = x.shape
    hd = C // num_heads
    scale = hd ** (-0.5)
    qkv = x @ w_qkv                                   # (B, N, 3C)
    qkv = qkv.reshape(B, N, 3, num_heads, hd).transpose(2, 0, 3, 1, 4)
    q, k, v = qkv[0] * scale, qkv[1], qkv[2]          # (B, H, N, hd)
    attn = jax.nn.softmax(q @ jnp.swapaxes(k, -2, -1), axis=-1)
    out = (attn @ v).transpose(0, 2, 1, 3).reshape(B, N, C)
    return out @ w_proj + b_proj


if __name__ == "__main__":
    # Small but TPU-shaped sizes: two query tiles per batch row, lane-dense C.
    B, N, d_model, num_heads = 2, 256, 128, 8

    key = jax.random.PRNGKey(0)
    kx, k1, k2, k3 = jax.random.split(key, 4)

    x = jax.random.normal(kx, (B, N, d_model), dtype=jnp.float32)
    # PyTorch Linear stores weight as (out, in) and computes x @ W.T; sample W
    # directly in (in, out) layout so the math is identical.
    w_qkv = jax.random.normal(k1, (d_model, 3 * d_model), dtype=jnp.float32) * 0.05
    w_proj = jax.random.normal(k2, (d_model, d_model), dtype=jnp.float32) * 0.05
    b_proj = jax.random.normal(k3, (d_model,), dtype=jnp.float32) * 0.05

    out = attention(x, w_qkv, w_proj, b_proj, num_heads=num_heads, q_tile=128)
    out = jax.block_until_ready(out)

    ref = attention_ref(x, w_qkv, w_proj, b_proj, num_heads=num_heads)
    assert out.shape == (B, N, d_model)
    # bf16 MXU operands + approx softmax reciprocal -> modest tolerance.
    max_err = float(jnp.max(jnp.abs(out - ref)))
    assert jnp.allclose(out, ref, atol=3e-2, rtol=3e-2), \
        f"mismatch vs reference (max abs err {max_err})"

    print("KERNEL_OK")
</pallas_src>

<mosaic_0001>
module attributes {stable_mosaic.version = 11 : i64} {
  func.func @_kv_project_kernel(%arg0: i32, %arg1: i32, %arg2: memref<1x256x128xbf16, #tpu.memory_space<vmem>>, %arg3: memref<256x128xbf16, #tpu.memory_space<vmem>>, %arg4: memref<1x256x256xbf16, #tpu.memory_space<vmem>>) attributes {dimension_semantics = [#tpu.dimension_semantics<parallel>, #tpu.dimension_semantics<parallel>], iteration_bounds = array<i64: 2, 1>, scalar_prefetch = 0 : i64, scratch_operands = 0 : i64, tpu.core_type = #tpu.core_type<tc>, window_params = [{transform_indices = @transform_0, window_bounds = array<i64: 1, 256, 128>}, {pipeline_mode = #tpu.pipeline_mode<synchronous>, transform_indices = @transform_1, window_bounds = array<i64: 256, 128>}, {transform_indices = @transform_2, window_bounds = array<i64: 1, 256, 256>}]} {
    %c0 = arith.constant 0 : index
    %c0_0 = arith.constant 0 : index
    %0 = vector.load %arg3[%c0, %c0_0] : memref<256x128xbf16, #tpu.memory_space<vmem>>, vector<256x128xbf16>
    %c0_1 = arith.constant 0 : index
    %c0_2 = arith.constant 0 : index
    %c0_3 = arith.constant 0 : index
    %1 = vector.load %arg2[%c0_1, %c0_2, %c0_3] : memref<1x256x128xbf16, #tpu.memory_space<vmem>>, vector<1x256x128xbf16>
    %2 = vector.shape_cast %1 : vector<1x256x128xbf16> to vector<256x128xbf16>
    %cst = arith.constant dense<0.000000e+00> : vector<256x256xf32>
    %3 = tpu.matmul %0, %2, %cst {dimension_numbers = #tpu.dot_dimension_numbers<[1], [1], [0], [0], [0, 0, 1, 0], [], []>} : vector<256x128xbf16>, vector<256x128xbf16>, vector<256x256xf32> -> vector<256x256xf32>
    %4 = arith.truncf %3 : vector<256x256xf32> to vector<256x256xbf16>
    %c0_4 = arith.constant 0 : index
    %c0_5 = arith.constant 0 : index
    %c0_6 = arith.constant 0 : index
    %5 = vector.load %arg4[%c0_4, %c0_5, %c0_6] : memref<1x256x256xbf16, #tpu.memory_space<vmem>>, vector<1x256x256xbf16>
    %6 = vector.shape_cast %5 : vector<1x256x256xbf16> to vector<256x256xbf16>
    %7 = vector.shape_cast %4 : vector<256x256xbf16> to vector<1x256x256xbf16>
    tpu.vector_store %arg4[%c0_4, %c0_5, %c0_6], %7 {strides = array<i32>} : memref<1x256x256xbf16, #tpu.memory_space<vmem>>, vector<1x256x256xbf16>,
    return
  }
  func.func @transform_0(%arg0: i32, %arg1: i32) -> (i32, i32, i32) {
    %c0_i32 = arith.constant 0 : i32
    %c0_i32_0 = arith.constant 0 : i32
    return %arg0, %arg1, %c0_i32 : i32, i32, i32
  }
  func.func @transform_1(%arg0: i32, %arg1: i32) -> (i32, i32) {
    %c0_i32 = arith.constant 0 : i32
    %c0_i32_0 = arith.constant 0 : i32
    %c0_i32_1 = arith.constant 0 : i32
    return %c0_i32, %c0_i32_0 : i32, i32
  }
  func.func @transform_2(%arg0: i32, %arg1: i32) -> (i32, i32, i32) {
    %c0_i32 = arith.constant 0 : i32
    %c0_i32_0 = arith.constant 0 : i32
    return %arg0, %c0_i32, %arg1 : i32, i32, i32
  }
}

</mosaic_0001>

<bundles_post_ra>
// kernel: tpu_custom_call.1
= control target key start
LH: loop header
LB: loop body
LE: loop exit
PB: predicated region body
PF: predicated region fallthrough
CT: control target
= control target key end

     0   :  { %7 = vsyncpa [#allocation3], 0  ;;  %s1719_s0 = inlined_call_operand.hbm [shape: bf16[2,256,128], index: 0, kind: input, shape index: {}]   ;;  %s1720_s1 = inlined_call_operand.hbm [shape: bf16[256,128], index: 1, kind: input, shape index: {}]   ;;  %s1721_s2 = inlined_call_operand.hbm [shape: bf16[2,256,256], index: 2, kind: output, shape index: {}]  }
   0x1   :  { %9 = vsyncpa [#allocation3 + $0x1], 0 }
   0x2   :  { %10 = vsyncpa [#allocation6], 0 }
   0x3   :  { %11 = vsyncpa [#allocation4], 0 }
   0x4   :  { %13 = vsyncpa [#allocation4 + $0x1], 0  ;;  %s1440_s9 = smov 0   ;;  %s1442_s10 = smov 0  }
   0x5   :  { %s1444_s11 = smov 0   ;;  %s1446_s12 = smov 0  }
   0x6   :  { %s1448_s13 = smov 0   ;;  %s1450_s14 = smov 0  }
   0x7 LB: > { %s984_s15 = sadd.s32 4294967295, %s1416_s14   ;;  %s985_s16 = sadd.s32 4294967294, %s1416_s14   ;;  %s1416_s14 = sphi %s1450_s14, %s19_s14   ;;  %s1412_s13 = sphi %s1448_s13, %s1745_s13   ;;  %s1408_s12 = sphi %s1446_s12, %s1744_s12   ;;  %s1404_s11 = sphi %s1444_s11, %s1743_s11   ;;  %s1400_s10 = sphi %s1442_s10, %s1742_s10   ;;  %s1396_s9 = sphi %s1440_s9, %s1741_s9  }
   0x8   : > { %p53_p0 = scmp.ne.s32.totalorder %s1400_s10, %s1396_s9  ;;  %p1474_p1 = scmp.eq.s32.totalorder %s984_s15, 0 }
   0x9   : > { %p1478_p2 = scmp.eq.s32.totalorder %s984_s15, 1  ;;  %p106_p3 = scmp.eq.s32.totalorder %s985_s16, 1 }
   0xa   : > { %s1726_s17 = scalar_select %p1474_p1, 1, 0 }
   0xb   : > { %s1727_s18 = scalar_select %p1478_p2, 1, 0 }
   0xc   : > { %p1484_p4 = por %p1474_p1, %p53_p0  ;;  %p986_p5 = scmp.ge.s32.totalorder %s1416_s14, 1 }
   0xd   : > { %p1489_p6 = por %p106_p3, %p53_p0  ;;  %p113_p7 = scmp.lt.s32.totalorder %s1416_s14, 3 }
   0xe   : > { %s1728_s19 = scalar_select %p1484_p4, 1, 0 }
   0xf   : > { %s1729_s20 = scalar_select %p1489_p6, 1, 0 }
  0x10   : > { %p1494_p8 = pnand %p986_p5, %p113_p7  ;;  %s1418_s22 = smov [#allocation5]  }
  0x11   : > { %s125_s23 = sshll.u32 %s1418_s22, 4  ;;  %s31_s25 = sadd.s32 1, %s1412_s13  ;;  %s126_s23 = int_to_ptr.vmem [resolvable:$true] %s125_s23 }
  0x12   : > { %s1730_s21 = scalar_select %p1494_p8, 1, 0 }
  0x13   : > { %p1171_p9 = pneg %p1494_p8  ;;  %s1272_s28 = scalar_lea.hbm %s1720_s1, 2048 }
  0x14   : > { %p1273_p12 = scmp.ne.s32.totalorder %s1720_s1, %s1272_s28  ;;  %p1279_p5 = scmp.lt.u32.totalorder %s1272_s28, %s1720_s1 }
  0x15   : > { %p1503_p11 = pnand %p1171_p9, %p1474_p1 }
  0x17   : > { %p1274_p13 = pneg %p1503_p11 }
  0x19   : > { %p1275_p0 = pnand %p1274_p13, %p1273_p12 }
  0x1b   : > { %p1276_p3 = pneg %p1275_p0 }
  0x1d   : > { %p1281_p7 = pnand %p1279_p5, %p1276_p3 }
  0x1f   : > { %1284 = shalt.err (!%p1281_p7)
}
  0x20   : > { %s1285_s5 = scalar_lea.vmem %s126_s23, 2048  ;;  %p1293_p1 = scmp.lt.s32.totalorder %s126_s23, %s126_s23 }
  0x21   : > { %p1286_p9 = scmp.ne.s32.totalorder %s126_s23, %s1285_s5  ;;  %p1294_p4 = scmp.lt.s32.totalorder %s1285_s5, %s1285_s5 }
  0x23   : > { %p1288_p10 = pnand %p1286_p9, %p1274_p13  ;;  %p1295_p8 = por %p1294_p4, %p1293_p1 }
  0x25   : > { %p1289_p6 = pneg %p1288_p10 }
  0x27   : > { %p1296_p2 = pnand %p1295_p8, %p1289_p6 }
  0x29   : > { %1299 = shalt.err (!%p1296_p2)
}
  0x2a   : > { %s1419_s6 = smov 64   ;;  %s1420_s7 = smov 4  }
  0x2b   : > { %1174 = dma.hbm_to_vmem [thread:$0]  (!%p1503_p11), %s1720_s1, 2048, %s126_s23, [#allocation6], %s1419_s6, %s1419_s6, %s1420_s7  }
  0x2c   : > { %p33_p1 = scmp.ge.s32.totalorder %s31_s25, 2  ;;  %s40_s16 = sadd.s32 1, %s1404_s11 }
  0x2d   : > { %p47_p2 = scmp.ne.s32.totalorder %s1404_s11, %s1400_s10  ;;  %p48_p4 = scmp.eq.s32.totalorder %s1416_s14, 0 }
  0x2e   : > { %s1747_s25 = smov (%p33_p1, %s31_s25), 0  ;;  %p1733_p8 = scmp.ne.s32.totalorder %s1727_s18, 0 }
  0x2f   : > { %p1533_p6 = por %p48_p4, %p47_p2  ;;  %s35_s26 = ssub.s32 %s1412_s13, %s1747_s25 }
  0x30   : > { %p1539_p10 = por %p1733_p8, %p47_p2  ;;  %p1184_p12 = scmp.lt.s32.totalorder %s1416_s14, 2 }
  0x31   : > { %p38_p11 = scmp.eq.s32.totalorder %s35_s26, 0  ;;  %s139_s23 = sand.u32 1, %s1404_s11  }
  0x32   : > { %s989_s27 = sshll.u32 %s139_s23, 7  ;;  %s1065_s29 = sshll.u32 %s1412_s13, 11 }
  0x33   : > { %s1548_s28 = scalar_select %p38_p11, %s1404_s11, %s40_s16  }
  0x34   : > { %s1554_s4 = scalar_lea.hbm %s1719_s0, %s1065_s29  ;;  %s143_s18 = scalar_lea.vmem [#allocation2], %s989_s27 }
  0x35   : > { %s152_s5 = sshll.u32 %s143_s18, 4  ;;  %p1560_p13 = pnand %p1184_p12, %p1533_p6  ;;  %s1556_s5 = int_to_ptr.vmem [resolvable:$true] %s152_s5 }
  0x36   : > { %s1564_s15 = scalar_lea.sflag [#allocation3], %s139_s23  ;;  %s1300_s16 = scalar_lea.hbm %s1554_s4, 2048 }
  0x37   : > { %p1301_p0 = scmp.ne.s32.totalorder %s1554_s4, %s1300_s16  ;;  %p1302_p3 = pneg %p1560_p13 }
  0x38   : > { %s1305_s22 = scalar_lea.hbm %s1719_s0, 4096  ;;  %p1306_p9 = scmp.lt.u32.totalorder %s1554_s4, %s1719_s0 }
  0x39   : > { %p1303_p5 = pnand %p1302_p3, %p1301_p0  ;;  %p1307_p1 = scmp.lt.u32.totalorder %s1305_s22, %s1300_s16 }
  0x3a   : > { %p1309_p4 = scmp.lt.u32.totalorder %s1300_s16, %s1554_s4 }
  0x3b   : > { %p1304_p7 = pneg %p1303_p5  ;;  %p1308_p2 = por %p1307_p1, %p1306_p9 }
  0x3d   : > { %p1310_p6 = por %p1309_p4, %p1308_p2 }
  0x3f   : > { %p1311_p8 = pnand %p1310_p6, %p1304_p7 }
  0x41   : > { %1314 = shalt.err (!%p1311_p8)
}
  0x42   : > { %s1315_s23 = scalar_lea.vmem %s1556_s5, 2048  ;;  %s1421_s3 = smov [#allocation2]  }
  0x43   : > { %p1316_p12 = scmp.ne.s32.totalorder %s1556_s5, %s1315_s23  ;;  %s1320_s18 = sshll.u32 %s1421_s3, 4  ;;  %s1321_s18 = int_to_ptr.vmem [resolvable:$false] %s1320_s18 }
  0x44   : > { %s1322_s26 = scalar_lea.vmem %s1321_s18, 4096  ;;  %p1323_p5 = scmp.lt.s32.totalorder %s1556_s5, %s1321_s18 }
  0x45   : > { %p1318_p11 = pnand %p1316_p12, %p1302_p3  ;;  %p1324_p9 = scmp.lt.s32.totalorder %s1322_s26, %s1315_s23 }
  0x47   : > { %p1319_p0 = pneg %p1318_p11  ;;  %p1325_p1 = por %p1324_p9, %p1323_p5 }
  0x49   : > { %p1326_p2 = pnand %p1325_p1, %p1319_p0 }
  0x4b   : > { %1329 = shalt.err (!%p1326_p2)
}
  0x4c   : > { %1178 = dma.hbm_to_vmem [thread:$0]  (!%p1560_p13), %s1554_s4, 2048, %s1556_s5, %s1564_s15, %s1419_s6, %s1419_s6, %s1420_s7  }
  0x4d   : > { %p1736_p3 = scmp.ne.s32.totalorder %s1730_s21, 0 }
  0x4e   : > { %s1598_s16 = sand.u32 (!%p1736_p3), 1, %s1400_s10   ;;  %p1737_p7 = scmp.ne.s32.totalorder (!%p1736_p3), %s1728_s19, 0 }
  0x4f   : > { %164 = sbr.rel (%p1736_p3) target bundleno = 443 (0x1bb), region = 28  ;;  %s993_s27 = sshll.u32 (!%p1736_p3), %s1598_s16, 7 }
  0x50   : > { %s167_s22 = scalar_lea.sflag (!%p1736_p3), [#allocation3], %s1598_s16  ;;  %s1602_s29 = scalar_lea.vmem (!%p1736_p3), [#allocation2], %s993_s27 }
  0x56   : > { %1383 = dma.done.wait (%p1737_p7), %s167_s22, 2048  }
  0x57   : > { %1385 = vsyncadd (%p1737_p7), %s167_s22, 4294965248  ;;  %p1738_p13 = scmp.ne.s32.totalorder %s1726_s17, 0 }
  0x59   : > { %1387 = dma.done.wait (%p1738_p13), [#allocation6], 2048  }
  0x5a   : > { %1389 = vsyncadd (%p1738_p13), [#allocation6], 4294965248  ;;  %v1240_v0 = vld [vmem:[%s1602_s29 + $0x40] sm:$0xff]   ;;  %v1242_v2 = vld [vmem:[%s1602_s29 + $0x48] sm:$0xff]   ;;  %s995_s17 = sshll.u32 %s1598_s16, 8  ;;  %s1098_s21 = sshll.u32 %s1408_s12, 12 }
  0x5b   : > { %v1241_v1 = vld [vmem:[%s1602_s29] sm:$0xff]   ;;  %1099 = vmatprep.subr.bf16.mxu0 %v1240_v0  ;;  %1147 = vmatprep.subr.bf16.mxu1 %v1240_v0  ;;  %v1243_v3 = vld [vmem:[%s1602_s29 + $0x8] sm:$0xff]   ;;  %v1244_v4 = vld [vmem:[%s1602_s29 + $0x50] sm:$0xff]   ;;  %s1629_s19 = scalar_lea.vmem [#allocation7], %s995_s17  ;;  %s1664_s5 = scalar_lea.hbm %s1721_s2, %s1098_s21 }
  0x5c   : > { %1100 = vmatpush3.bf16.xpose.msra.mxu0 %v1241_v1  ;;  %1155 = vmatpush3.bf16.xpose.msra.mxu1 %v1241_v1  ;;  %v1245_v5 = vld [vmem:[%s1602_s29 + $0x10] sm:$0xff]   ;;  %v1246_v6 = vld [vmem:[%s1602_s29 + $0x58] sm:$0xff]   ;;  %v1256_v7 = vld [vmem:[#allocation5] sm:$0xff]   ;;  %s887_s6 = sshll.u32 %s1629_s19, 4  ;;  %s872_s12 = scalar_lea.sflag [#allocation4], %s1598_s16  ;;  %s1666_s6 = int_to_ptr.vmem [resolvable:$true] %s887_s6 }
  0x5d   : > { %1101 = vmatprep.subr.bf16.mxu0 %v1242_v2  ;;  %1148 = vmatprep.subr.bf16.mxu1 %v1242_v2  ;;  %v1257_v8 = vld [vmem:[#allocation5 + $0x40] sm:$0xff]   ;;  %v1247_v9 = vld [vmem:[%s1602_s29 + $0x18] sm:$0xff]   ;;  %v1250_v12 = vld [vmem:[%s1602_s29 + $0x68] sm:$0xff]   ;;  %s1330_s8 = scalar_lea.vmem %s1666_s6, 4096  ;;  %s1422_s15 = smov [#allocation7]  }
  0x5e   : > { %1115 = vmatprep.mubr.bf16.mxu0 %v1256_v7  ;;  %1131 = vmatprep.mubr.bf16.mxu1 %v1257_v8  ;;  %v1248_v10 = vld [vmem:[%s1602_s29 + $0x60] sm:$0xff]   ;;  %v1251_v13 = vld [vmem:[%s1602_s29 + $0x28] sm:$0xff]   ;;  %v1252_v14 = vld [vmem:[%s1602_s29 + $0x70] sm:$0xff]   ;;  %p1331_p4 = scmp.ne.s32.totalorder %s1666_s6, %s1330_s8  ;;  %s1334_s30 = sshll.u32 %s1422_s15, 4  ;;  %s1335_s30 = int_to_ptr.vmem [resolvable:$false] %s1334_s30 }
  0x5f   : > { %v1249_v11 = vld [vmem:[%s1602_s29 + $0x20] sm:$0xff]   ;;  %v1253_v15 = vld [vmem:[%s1602_s29 + $0x30] sm:$0xff]   ;;  %v1254_v16 = vld [vmem:[%s1602_s29 + $0x78] sm:$0xff]   ;;  %s1336_s23 = scalar_lea.vmem %s1335_s30, 8192  ;;  %p1337_p12 = scmp.lt.s32.totalorder %s1666_s6, %s1335_s30 }
  0x60   : > { %v1255_v17 = vld [vmem:[%s1602_s29 + $0x38] sm:$0xff]   ;;  %v1258_v18 = vld [vmem:[#allocation5 + $0x8] sm:$0xff]   ;;  %v1260_v20 = vld [vmem:[#allocation5 + $0x10] sm:$0xff]   ;;  %p1332_p6 = pnand %p1331_p4, %p1539_p10  ;;  %p1338_p11 = scmp.lt.s32.totalorder %s1336_s23, %s1330_s8 }
  0x61   : > { %v1259_v19 = vld [vmem:[#allocation5 + $0x48] sm:$0xff]   ;;  %v1261_v21 = vld [vmem:[#allocation5 + $0x50] sm:$0xff]   ;;  %v1262_v22 = vld [vmem:[#allocation5 + $0x18] sm:$0xff]  }
  0x62   : > { %v1263_v23 = vld [vmem:[#allocation5 + $0x58] sm:$0xff]   ;;  %v1264_v24 = vld [vmem:[#allocation5 + $0x20] sm:$0xff]   ;;  %v1266_v26 = vld [vmem:[#allocation5 + $0x28] sm:$0xff]   ;;  %p1333_p8 = pneg %p1332_p6  ;;  %p1339_p0 = por %p1338_p11, %p1337_p12 }
  0x63   : > { %v1265_v25 = vld [vmem:[#allocation5 + $0x60] sm:$0xff]   ;;  %v1267_v27 = vld [vmem:[#allocation5 + $0x68] sm:$0xff]   ;;  %v1268_v28 = vld [vmem:[#allocation5 + $0x30] sm:$0xff]  }
  0x64   : > { %1102 = vmatpush3.bf16.xpose.msra.mxu0 %v1243_v3  ;;  %1156 = vmatpush3.bf16.xpose.msra.mxu1 %v1243_v3  ;;  %v1269_v29 = vld [vmem:[#allocation5 + $0x70] sm:$0xff]   ;;  %v1270_v30 = vld [vmem:[#allocation5 + $0x38] sm:$0xff]   ;;  %p1340_p5 = pnand %p1339_p0, %p1333_p8 }
  0x65   : > { %1103 = vmatprep.subr.bf16.mxu0 %v1244_v4  ;;  %1149 = vmatprep.subr.bf16.mxu1 %v1244_v4  ;;  %v1271_v31 = vld [vmem:[#allocation5 + $0x78] sm:$0xff]  }
  0x6c   : > { %1104 = vmatpush3.bf16.xpose.msra.mxu0 %v1245_v5  ;;  %1157 = vmatpush3.bf16.xpose.msra.mxu1 %v1245_v5 }
  0x6d   : > { %1105 = vmatprep.subr.bf16.mxu0 %v1246_v6  ;;  %1150 = vmatprep.subr.bf16.mxu1 %v1246_v6 }
  0x74   : > { %1106 = vmatpush3.bf16.xpose.msra.mxu0 %v1247_v9  ;;  %1158 = vmatpush3.bf16.xpose.msra.mxu1 %v1247_v9 }
  0x75   : > { %1107 = vmatprep.subr.bf16.mxu0 %v1248_v10  ;;  %1151 = vmatprep.subr.bf16.mxu1 %v1248_v10 }
  0x7c   : > { %1108 = vmatpush3.bf16.xpose.msra.mxu0 %v1249_v11  ;;  %1159 = vmatpush3.bf16.xpose.msra.mxu1 %v1249_v11 }
  0x7d   : > { %1109 = vmatprep.subr.bf16.mxu0 %v1250_v12  ;;  %1152 = vmatprep.subr.bf16.mxu1 %v1250_v12 }
  0x84   : > { %1110 = vmatpush3.bf16.xpose.msra.mxu0 %v1251_v13  ;;  %1160 = vmatpush3.bf16.xpose.msra.mxu1 %v1251_v13 }
  0x85   : > { %1111 = vmatprep.subr.bf16.mxu0 %v1252_v14  ;;  %1153 = vmatprep.subr.bf16.mxu1 %v1252_v14 }
  0x8c   : > { %1112 = vmatpush3.bf16.xpose.msra.mxu0 %v1253_v15  ;;  %1161 = vmatpush3.bf16.xpose.msra.mxu1 %v1253_v15 }
  0x8d   : > { %1113 = vmatprep.subr.bf16.mxu0 %v1254_v16  ;;  %1154 = vmatprep.subr.bf16.mxu1 %v1254_v16 }
  0x94   : > { %1114 = vmatpush3.bf16.xpose.msra.mxu0 %v1255_v17  ;;  %1162 = vmatpush3.bf16.xpose.msra.mxu1 %v1255_v17 }
  0x9b   : > { %1116 = vmatmul.mubr.bf16.vlgmr.msra.gmra.mrb[0].mxu0 %v1256_v7  ;;  %1132 = vmatmul.mubr.bf16.vlgmr.msra.gmra.mrb[0].mxu1 %v1257_v8 }
  0x9c   : > { %1117 = vmatprep.mubr.bf16.mxu0 %v1258_v18  ;;  %1133 = vmatprep.mubr.bf16.mxu1 %v1259_v19 }
  0xa3   : > { %1118 = vmatmul.mubr.bf16.gmra.mrb[4].mxu0 %v1258_v18  ;;  %1134 = vmatmul.mubr.bf16.gmra.mrb[4].mxu1 %v1259_v19 }
  0xa4   : > { %1119 = vmatprep.mubr.bf16.mxu0 %v1260_v20  ;;  %1135 = vmatprep.mubr.bf16.mxu1 %v1261_v21 }
  0xab   : > { %1120 = vmatmul.mubr.bf16.gmra.mrb[8].mxu0 %v1260_v20  ;;  %1136 = vmatmul.mubr.bf16.gmra.mrb[8].mxu1 %v1261_v21 }
  0xac   : > { %1121 = vmatprep.mubr.bf16.mxu0 %v1262_v22  ;;  %1137 = vmatprep.mubr.bf16.mxu1 %v1263_v23 }
  0xb3   : > { %1122 = vmatmul.mubr.bf16.gmra.mrb[12].mxu0 %v1262_v22  ;;  %1138 = vmatmul.mubr.bf16.gmra.mrb[12].mxu1 %v1263_v23 }
  0xb4   : > { %1123 = vmatprep.mubr.bf16.mxu0 %v1264_v24  ;;  %1139 = vmatprep.mubr.bf16.mxu1 %v1265_v25 }
  0xbb   : > { %1124 = vmatmul.mubr.bf16.gmra.mrb[16].mxu0 %v1264_v24  ;;  %1140 = vmatmul.mubr.bf16.gmra.mrb[16].mxu1 %v1265_v25 }
  0xbc   : > { %1125 = vmatprep.mubr.bf16.mxu0 %v1266_v26  ;;  %1141 = vmatprep.mubr.bf16.mxu1 %v1267_v27 }
  0xc3   : > { %1126 = vmatmul.mubr.bf16.gmra.mrb[20].mxu0 %v1266_v26  ;;  %1142 = vmatmul.mubr.bf16.gmra.mrb[20].mxu1 %v1267_v27 }
  0xc4   : > { %1127 = vmatprep.mubr.bf16.mxu0 %v1268_v28  ;;  %1143 = vmatprep.mubr.bf16.mxu1 %v1269_v29 }
  0xcb   : > { %1128 = vmatmul.mubr.bf16.gmra.mrb[24].mxu0 %v1268_v28  ;;  %1144 = vmatmul.mubr.bf16.gmra.mrb[24].mxu1 %v1269_v29 }
  0xcc   : > { %1129 = vmatprep.mubr.bf16.mxu0 %v1270_v30  ;;  %1145 = vmatprep.mubr.bf16.mxu1 %v1271_v31 }
  0xd3   : > { %1130 = vmatmul.mubr.bf16.gmra.mrb[28].mxu0 %v1270_v30  ;;  %1146 = vmatmul.mubr.bf16.gmra.mrb[28].mxu1 %v1271_v31 }
 0x16e   : > { %v488_v32 = vpop.f32.mrb[0].mxu0  ;;  %v568_v33 = vpop.f32.mrb[0].mxu1 }
 0x16f   : > { %v490_v34 = vpop.f32.mrb[1].mxu0  ;;  %v570_v35 = vpop.f32.mrb[1].mxu1 }
 0x170   : > { %v1066_v36 = vpack.c.bf16 %v490_v34, %v488_v32  ;;  %v1082_v37 = vpack.c.bf16 %v570_v35, %v568_v33  ;;  %v492_v38 = vpop.f32.mrb[2].mxu0  ;;  %v572_v39 = vpop.f32.mrb[2].mxu1 }
 0x171   : > { %v494_v40 = vpop.f32.mrb[3].mxu0  ;;  %v574_v41 = vpop.f32.mrb[3].mxu1 }
 0x172   : > { %839 = vst [vmem:[%s1629_s19] sm:$0xff] %v1066_v36  ;;  %855 = vst [vmem:[%s1629_s19 + $0x80] sm:$0xff] %v1082_v37  ;;  %v1067_v42 = vpack.c.bf16 %v494_v40, %v492_v38  ;;  %v1083_v43 = vpack.c.bf16 %v574_v41, %v572_v39 }
 0x174   : > { %840 = vst [vmem:[%s1629_s19 + $0x8] sm:$0xff] %v1067_v42  ;;  %856 = vst [vmem:[%s1629_s19 + $0x88] sm:$0xff] %v1083_v43 }
 0x176   : > { %v498_v44 = vpop.f32.mrb[4].mxu0  ;;  %v578_v45 = vpop.f32.mrb[4].mxu1 }
 0x177   : > { %v500_v46 = vpop.f32.mrb[5].mxu0  ;;  %v580_v47 = vpop.f32.mrb[5].mxu1 }
 0x178   : > { %v1068_v48 = vpack.c.bf16 %v500_v46, %v498_v44  ;;  %v1084_v49 = vpack.c.bf16 %v580_v47, %v578_v45  ;;  %v502_v50 = vpop.f32.mrb[6].mxu0  ;;  %v582_v51 = vpop.f32.mrb[6].mxu1 }
 0x179   : > { %v504_v52 = vpop.f32.mrb[7].mxu0  ;;  %v584_v53 = vpop.f32.mrb[7].mxu1 }
 0x17a   : > { %841 = vst [vmem:[%s1629_s19 + $0x10] sm:$0xff] %v1068_v48  ;;  %857 = vst [vmem:[%s1629_s19 + $0x90] sm:$0xff] %v1084_v49  ;;  %v1069_v54 = vpack.c.bf16 %v504_v52, %v502_v50  ;;  %v1085_v55 = vpack.c.bf16 %v584_v53, %v582_v51 }
 0x17c   : > { %842 = vst [vmem:[%s1629_s19 + $0x18] sm:$0xff] %v1069_v54  ;;  %858 = vst [vmem:[%s1629_s19 + $0x98] sm:$0xff] %v1085_v55 }
 0x17e   : > { %v508_v56 = vpop.f32.mrb[8].mxu0  ;;  %v588_v57 = vpop.f32.mrb[8].mxu1 }
 0x17f   : > { %v510_v58 = vpop.f32.mrb[9].mxu0  ;;  %v590_v59 = vpop.f32.mrb[9].mxu1 }
 0x180   : > { %v1070_v60 = vpack.c.bf16 %v510_v58, %v508_v56  ;;  %v1086_v61 = vpack.c.bf16 %v590_v59, %v588_v57  ;;  %v512_v62 = vpop.f32.mrb[10].mxu0  ;;  %v592_v63 = vpop.f32.mrb[10].mxu1 }
 0x181   : > { %v514_v0 = vpop.f32.mrb[11].mxu0  ;;  %v594_v1 = vpop.f32.mrb[11].mxu1 }
 0x182   : > { %843 = vst [vmem:[%s1629_s19 + $0x20] sm:$0xff] %v1070_v60  ;;  %859 = vst [vmem:[%s1629_s19 + $0xa0] sm:$0xff] %v1086_v61  ;;  %v1071_v2 = vpack.c.bf16 %v514_v0, %v512_v62  ;;  %v1087_v3 = vpack.c.bf16 %v594_v1, %v592_v63 }
 0x184   : > { %844 = vst [vmem:[%s1629_s19 + $0x28] sm:$0xff] %v1071_v2  ;;  %860 = vst [vmem:[%s1629_s19 + $0xa8] sm:$0xff] %v1087_v3 }
 0x186   : > { %v518_v4 = vpop.f32.mrb[12].mxu0  ;;  %v598_v5 = vpop.f32.mrb[12].mxu1 }
 0x187   : > { %v520_v6 = vpop.f32.mrb[13].mxu0  ;;  %v600_v7 = vpop.f32.mrb[13].mxu1 }
 0x188   : > { %v1072_v8 = vpack.c.bf16 %v520_v6, %v518_v4  ;;  %v1088_v9 = vpack.c.bf16 %v600_v7, %v598_v5  ;;  %v522_v10 = vpop.f32.mrb[14].mxu0  ;;  %v602_v11 = vpop.f32.mrb[14].mxu1 }
 0x189   : > { %v524_v12 = vpop.f32.mrb[15].mxu0  ;;  %v604_v13 = vpop.f32.mrb[15].mxu1 }
 0x18a   : > { %845 = vst [vmem:[%s1629_s19 + $0x30] sm:$0xff] %v1072_v8  ;;  %861 = vst [vmem:[%s1629_s19 + $0xb0] sm:$0xff] %v1088_v9  ;;  %v1073_v14 = vpack.c.bf16 %v524_v12, %v522_v10  ;;  %v1089_v15 = vpack.c.bf16 %v604_v13, %v602_v11 }
 0x18c   : > { %846 = vst [vmem:[%s1629_s19 + $0x38] sm:$0xff] %v1073_v14  ;;  %862 = vst [vmem:[%s1629_s19 + $0xb8] sm:$0xff] %v1089_v15 }
 0x18e   : > { %v528_v16 = vpop.f32.mrb[16].mxu0  ;;  %v608_v17 = vpop.f32.mrb[16].mxu1 }
 0x18f   : > { %v530_v18 = vpop.f32.mrb[17].mxu0  ;;  %v610_v19 = vpop.f32.mrb[17].mxu1 }
 0x190   : > { %v1074_v20 = vpack.c.bf16 %v530_v18, %v528_v16  ;;  %v1090_v21 = vpack.c.bf16 %v610_v19, %v608_v17  ;;  %v532_v22 = vpop.f32.mrb[18].mxu0  ;;  %v612_v23 = vpop.f32.mrb[18].mxu1 }
 0x191   : > { %v534_v24 = vpop.f32.mrb[19].mxu0  ;;  %v614_v25 = vpop.f32.mrb[19].mxu1 }
 0x192   : > { %847 = vst [vmem:[%s1629_s19 + $0x40] sm:$0xff] %v1074_v20  ;;  %863 = vst [vmem:[%s1629_s19 + $0xc0] sm:$0xff] %v1090_v21  ;;  %v1075_v26 = vpack.c.bf16 %v534_v24, %v532_v22  ;;  %v1091_v27 = vpack.c.bf16 %v614_v25, %v612_v23 }
 0x194   : > { %848 = vst [vmem:[%s1629_s19 + $0x48] sm:$0xff] %v1075_v26  ;;  %864 = vst [vmem:[%s1629_s19 + $0xc8] sm:$0xff] %v1091_v27 }
 0x196   : > { %v538_v28 = vpop.f32.mrb[20].mxu0  ;;  %v618_v29 = vpop.f32.mrb[20].mxu1 }
 0x197   : > { %v540_v30 = vpop.f32.mrb[21].mxu0  ;;  %v620_v31 = vpop.f32.mrb[21].mxu1 }
 0x198   : > { %v1076_v32 = vpack.c.bf16 %v540_v30, %v538_v28  ;;  %v1092_v33 = vpack.c.bf16 %v620_v31, %v618_v29  ;;  %v542_v34 = vpop.f32.mrb[22].mxu0  ;;  %v622_v35 = vpop.f32.mrb[22].mxu1 }
 0x199   : > { %v544_v36 = vpop.f32.mrb[23].mxu0  ;;  %v624_v37 = vpop.f32.mrb[23].mxu1 }
 0x19a   : > { %849 = vst [vmem:[%s1629_s19 + $0x50] sm:$0xff] %v1076_v32  ;;  %865 = vst [vmem:[%s1629_s19 + $0xd0] sm:$0xff] %v1092_v33  ;;  %v1077_v38 = vpack.c.bf16 %v544_v36, %v542_v34  ;;  %v1093_v39 = vpack.c.bf16 %v624_v37, %v622_v35 }
 0x19c   : > { %850 = vst [vmem:[%s1629_s19 + $0x58] sm:$0xff] %v1077_v38  ;;  %866 = vst [vmem:[%s1629_s19 + $0xd8] sm:$0xff] %v1093_v39 }
 0x19e   : > { %v548_v40 = vpop.f32.mrb[24].mxu0  ;;  %v628_v41 = vpop.f32.mrb[24].mxu1 }
 0x19f   : > { %v550_v42 = vpop.f32.mrb[25].mxu0  ;;  %v630_v43 = vpop.f32.mrb[25].mxu1 }
 0x1a0   : > { %v1078_v44 = vpack.c.bf16 %v550_v42, %v548_v40  ;;  %v1094_v45 = vpack.c.bf16 %v630_v43, %v628_v41  ;;  %v552_v46 = vpop.f32.mrb[26].mxu0  ;;  %v632_v47 = vpop.f32.mrb[26].mxu1 }
 0x1a1   : > { %v554_v48 = vpop.f32.mrb[27].mxu0  ;;  %v634_v49 = vpop.f32.mrb[27].mxu1 }
 0x1a2   : > { %851 = vst [vmem:[%s1629_s19 + $0x60] sm:$0xff] %v1078_v44  ;;  %867 = vst [vmem:[%s1629_s19 + $0xe0] sm:$0xff] %v1094_v45  ;;  %v1079_v50 = vpack.c.bf16 %v554_v48, %v552_v46  ;;  %v1095_v51 = vpack.c.bf16 %v634_v49, %v632_v47 }
 0x1a4   : > { %852 = vst [vmem:[%s1629_s19 + $0x68] sm:$0xff] %v1079_v50  ;;  %868 = vst [vmem:[%s1629_s19 + $0xe8] sm:$0xff] %v1095_v51 }
 0x1a6   : > { %v558_v52 = vpop.f32.mrb[28].mxu0  ;;  %v638_v53 = vpop.f32.mrb[28].mxu1 }
 0x1a7   : > { %v560_v54 = vpop.f32.mrb[29].mxu0  ;;  %v640_v55 = vpop.f32.mrb[29].mxu1 }
 0x1a8   : > { %v1080_v56 = vpack.c.bf16 %v560_v54, %v558_v52  ;;  %v1096_v57 = vpack.c.bf16 %v640_v55, %v638_v53  ;;  %v562_v58 = vpop.f32.mrb[30].mxu0  ;;  %v642_v59 = vpop.f32.mrb[30].mxu1 }
 0x1a9   : > { %v564_v60 = vpop.f32.mrb[31].mxu0  ;;  %v644_v61 = vpop.f32.mrb[31].mxu1 }
 0x1aa   : > { %853 = vst [vmem:[%s1629_s19 + $0x70] sm:$0xff] %v1080_v56  ;;  %869 = vst [vmem:[%s1629_s19 + $0xf0] sm:$0xff] %v1096_v57  ;;  %v1081_v62 = vpack.c.bf16 %v564_v60, %v562_v58  ;;  %v1097_v63 = vpack.c.bf16 %v644_v61, %v642_v59 }
 0x1ac   : > { %854 = vst [vmem:[%s1629_s19 + $0x78] sm:$0xff] %v1081_v62  ;;  %870 = vst [vmem:[%s1629_s19 + $0xf8] sm:$0xff] %v1097_v63 }
 0x1ad   : > { %1343 = shalt.err (!%p1340_p5)
}
 0x1ae   : > { %s1344_s3 = scalar_lea.hbm %s1664_s5, 4096  ;;  %s1348_s27 = scalar_lea.hbm %s1721_s2, 8192 }
 0x1af   : > { %p1345_p9 = scmp.ne.s32.totalorder %s1664_s5, %s1344_s3  ;;  %p1349_p3 = scmp.lt.u32.totalorder %s1664_s5, %s1721_s2 }
 0x1b0   : > { %p1350_p7 = scmp.lt.u32.totalorder %s1348_s27, %s1344_s3  ;;  %p1352_p4 = scmp.lt.u32.totalorder %s1344_s3, %s1664_s5 }
 0x1b1   : > { %p1346_p1 = pnand %p1345_p9, %p1539_p10 }
 0x1b2   : > { %p1351_p13 = por %p1350_p7, %p1349_p3 }
 0x1b3   : > { %p1347_p2 = pneg %p1346_p1 }
 0x1b4   : > { %p1353_p6 = por %p1352_p4, %p1351_p13 }
 0x1b6   : > { %p1354_p8 = pnand %p1353_p6, %p1347_p2 }
 0x1b8   : > { %1357 = shalt.err (!%p1354_p8)
}
 0x1b9   : > { %s1423_s17 = smov 128   ;;  %s1424_s19 = smov 8  }
 0x1ba   : > { %1169 = dma.vmem_to_hbm [thread:$0]  (%p1539_p10), %s1666_s6, 4096, %s1664_s5, %s872_s12, %s1423_s17, %s1423_s17, %s1424_s19  }
 0x1bb PF: > { %s902_s21 = sand.u32 1, %s1396_s9   ;;  %p1739_p12 = scmp.ne.s32.totalorder %s1729_s20, 0 }
 0x1bc   : > { %p1740_p11 = scmp.ge.s32.totalorder %s1416_s14, 2  ;;  %s903_s7 = scalar_lea.sflag [#allocation4], %s902_s21 }
 0x1be   : > { %p1180_p0 = pnand %p1740_p11, %p1739_p12 }
 0x1c0   : > { %1391 = dma.done.wait (!%p1180_p0), %s903_s7, 4096  }
 0x1c1   : > { %1393 = vsyncadd (!%p1180_p0), %s903_s7, 4294963200  ;;  %s19_s14 = sadd.s32 1, %s1416_s14   ;;  %s1741_s9 = smov %s1400_s10 }
 0x1c2   : > { %p16_p5 = scmp.ge.s32.totalorder %s19_s14, 4   ;;  %s1742_s10 = smov %s1404_s11 }
 0x1c3   : > { %s1743_s11 = smov %s1548_s28  ;;  %s1744_s12 = smov %s1412_s13 }
 0x1c4   : > { %s1745_s13 = smov %s1747_s25  ;;  %18 = sbr.rel (!%p16_p5) target bundleno = 7 (0x7), region = 77 }
 0x1cb   :  { %908 = vsyncpa [#allocation3], 1 }
 0x1cc   :  { %910 = vsyncpa [#allocation3 + $0x1], 1 }
 0x1cd   :  { %911 = vsyncpa [#allocation6], 1 }
 0x1ce   :  { %912 = vsyncpa [#allocation4], 1 }
 0x1cf   :  { %914 = vsyncpa [#allocation4 + $0x1], 1 }

</bundles_post_ra>
